<compile_context>
chip_gen: v7x
topology: tpu7x:2x2x1
jax: 0.10.0
libtpu: 0.0.40
codegen_flags: <defaults>
</compile_context>

<pallas_src>
import functools

import jax
import jax.numpy as jnp
from jax.experimental import pallas as pl
from jax.experimental.pallas import tpu as pltpu


def _round_up(x, m):
    return ((x + m - 1) // m) * m


# ----------------------------------------------------------------------------
# Pallas kernel factory.
# refs layout: (x_ref, w0, b0, w1, b1, ..., wl, bl, out_ref)
#   x_ref : (TB, input_size)            streamed, any float dtype
#   w_l   : (fan_in_l, fan_out_l)       compute_dtype, VMEM resident (fused)
#   b_l   : (1, fan_out_l)              f32, VMEM resident
#   out   : (TB, H * output_size)       f32, head-major channel order
# Every layer is a single wide matmul for all heads (layer 0: shared-input
# concat; later layers: block-diagonal weights).
# ----------------------------------------------------------------------------
def _make_fused_kernel(num_layers, compute_dtype):
    def kernel(x_ref, *refs):
        out_ref = refs[-1]
        layer_refs = refs[:-1]
        z = x_ref[...].astype(compute_dtype)
        for l in range(num_layers):
            w_ref = layer_refs[2 * l]
            b_ref = layer_refs[2 * l + 1]
            acc = jnp.dot(z, w_ref[...], preferred_element_type=jnp.float32)
            acc = acc + b_ref[...]                 # f32 bias add (VPU)
            if l < num_layers - 1:
                acc = jnp.maximum(acc, 0.0)        # ReLU hidden activation, f32
                z = acc.astype(compute_dtype)
            else:
                z = acc
        out_ref[...] = z.astype(out_ref.dtype)
    return kernel


# ----------------------------------------------------------------------------
# One-time parameter packing (do this OUTSIDE the per-step jit):
#   layer 0 : (H, in, h0)  -> (in, H*h0)        heads concatenated on out dim
#   layer l : (H, di, do)  -> (H*di, H*do)      block-diagonal
#   bias  l : (H, 1, do)   -> (1, H*do)         f32
# Head-major column order everywhere == grouped Conv1d channel order.
# ----------------------------------------------------------------------------
def pack_params(params, *, compute_dtype=jnp.bfloat16):
    num_layers = len(params) // 2
    num_heads = int(params[0].shape[0])
    packed = []
    for l in range(num_layers):
        w = jnp.asarray(params[2 * l])        # (H, di, do)
        b = jnp.asarray(params[2 * l + 1])    # (H, 1, do)
        h, di, do = w.shape
        if l == 0:
            wf = jnp.transpose(w, (1, 0, 2)).reshape(di, h * do)
        else:
            eye = jnp.eye(h, dtype=w.dtype)
            wf = w[:, None, :, :] * eye[:, :, None, None]          # (H,H,di,do)
            wf = jnp.transpose(wf, (0, 2, 1, 3)).reshape(h * di, h * do)
        packed.append(wf.astype(compute_dtype))
        packed.append(b.reshape(1, h * do).astype(jnp.float32))
    return tuple(packed)
    # TODO(synk): for very large H / hidden sizes the block-diagonal weights can
    # outgrow VMEM; in that case move heads onto a second ("arbitrary") grid
    # axis instead of fusing them.


# ----------------------------------------------------------------------------
# pallas_call wrapper: batch-tiled grid, resident fused weights, VMEM budget.
# Returns the head-major flat output (batch, H * output_size), f32.
# ----------------------------------------------------------------------------
def parallel_mlp_pallas(x, packed_params, *, block_batch=1024,
                        vmem_budget_bytes=None):
    batch, input_size = x.shape
    num_layers = len(packed_params) // 2
    flat_out = int(packed_params[-2].shape[-1])     # H * output_size
    compute_dtype = packed_params[0].dtype

    # ---- VMEM budget -> batch tile ----------------------------------------
    if vmem_budget_bytes is None:
        try:
            phys = int(pltpu.get_tpu_info().vmem_capacity_bytes)
            vmem_budget_bytes = min(100 << 20, (phys * 3) // 4)   # ~100MiB on v5e/v6e, ~48MiB on v7x
        except Exception:
            vmem_budget_bytes = 48 << 20                          # safe on all generations
    # Resident weights/biases (constant index_map). Pallas double-buffers every
    # input by default, so budget 2x their size.
    # TODO(synk): pipeline_mode=pl.Buffered(1) on these specs would halve that
    # on VMEM-tight v7x configs.
    weight_bytes = 2 * sum(int(a.size) * int(a.dtype.itemsize)
                           for a in packed_params)
    bytes_per_row = 2 * (input_size * int(x.dtype.itemsize) + flat_out * 4)
    avail = max(vmem_budget_bytes - weight_bytes - (2 << 20), bytes_per_row * 16)

    tb = min(int(block_batch), int(avail // bytes_per_row))
    tb = max(16, (tb // 16) * 16)
    if batch > 32:
        # Guarantee >= 2 grid steps so ("parallel",) actually feeds both v7x TCs.
        tb = min(tb, _round_up(pl.cdiv(batch, 2), 16))
    tb = min(tb, _round_up(batch, 16))
    grid = (pl.cdiv(batch, tb),)          # ragged last block handled by Pallas

    # ---- specs --------------------------------------------------------------
    in_specs = [pl.BlockSpec((tb, input_size), lambda i: (i, 0))]
    for l in range(num_layers):
        w = packed_params[2 * l]
        b = packed_params[2 * l + 1]
        # Constant index_map -> fetched once, stays VMEM-resident over the grid.
        in_specs += [pl.BlockSpec(w.shape, lambda i: (0, 0)),
                     pl.BlockSpec(b.shape, lambda i: (0, 0))]
    out_specs = pl.BlockSpec((tb, flat_out), lambda i: (i, 0))

    flops = 2 * batch * sum(int(packed_params[2 * l].shape[0]) *
                            int(packed_params[2 * l].shape[1])
                            for l in range(num_layers))
    bytes_accessed = (batch * input_size * int(x.dtype.itemsize)
                      + batch * flat_out * 4
                      + sum(int(a.size) * int(a.dtype.itemsize)
                            for a in packed_params))

    return pl.pallas_call(
        _make_fused_kernel(num_layers, compute_dtype),
        out_shape=jax.ShapeDtypeStruct((batch, flat_out), jnp.float32),
        grid=grid,
        in_specs=in_specs,
        out_specs=out_specs,
        compiler_params=pltpu.CompilerParams(
            dimension_semantics=("parallel",),
            vmem_limit_bytes=int(vmem_budget_bytes)),
        cost_estimate=pl.CostEstimate(flops=int(flops), transcendentals=0,
                                      bytes_accessed=int(bytes_accessed)),
    )(x, *packed_params)


def parallel_mlp_forward(inputs, packed_params, num_heads, *, block_batch=1024):
    """Full ParallelMlp.forward: cat inputs on dim 1, run all heads, then the
    literal torch `flat.view(batch, -1, num_heads)` (pure reshape here)."""
    if isinstance(inputs, (list, tuple)):
        x = inputs[0] if len(inputs) == 1 else jnp.concatenate(inputs, axis=1)
    else:
        x = inputs
    flat = parallel_mlp_pallas(x, packed_params, block_batch=block_batch)
    return flat.reshape(x.shape[0], -1, num_heads)
    # TODO(synk): layer_norm (ParallelLayerNorm), dropout, and the
    # input_is_already_expanded path are not implemented (defaults are off).


# ----------------------------------------------------------------------------
# Parameter construction (mimics nn.Conv1d(kernel_size=1, groups=H) default
# init per head: U(-1/sqrt(fan_in), 1/sqrt(fan_in)) for weight and bias).
# Stored per head as w_l: (H, in, out), b_l: (H, 1, out).
# ----------------------------------------------------------------------------
def init_params(key, num_heads, input_size, hidden_sizes, output_size):
    dims = [input_size] + list(hidden_sizes) + [output_size]
    params = []
    keys = jax.random.split(key, 2 * (len(dims) - 1))
    for l in range(len(dims) - 1):
        fan_in, fan_out = dims[l], dims[l + 1]
        bound = float(fan_in) ** -0.5
        w = jax.random.uniform(keys[2 * l], (num_heads, fan_in, fan_out),
                               jnp.float32, -bound, bound)
        b = jax.random.uniform(keys[2 * l + 1], (num_heads, 1, fan_out),
                               jnp.float32, -bound, bound)
        params += [w, b]
    return tuple(params)


# Pure-JAX reference (per-head math + torch view semantics) for a sanity check.
def _reference_forward(x, params, num_heads):
    num_layers = len(params) // 2
    outs = []
    for h in range(num_heads):
        z = x
        for l in range(num_layers):
            w, b = params[2 * l], params[2 * l + 1]
            z = z @ w[h] + b[h]
            if l < num_layers - 1:
                z = jnp.maximum(z, 0.0)
        outs.append(z)
    flat = jnp.concatenate(outs, axis=-1)   # head-major channel order
    return flat.reshape(x.shape[0], -1, num_heads)


if __name__ == "__main__":
    key = jax.random.PRNGKey(0)
    num_heads = 4
    input_size = 20
    hidden_sizes = (32, 32)      # H * hidden = 128 -> one full MXU tile wide
    output_size = 3
    batch = 80                   # deliberately NOT a multiple of the batch tile
    block_batch = 32             # 3 grid steps, exercises ragged last block

    k_x, k_p = jax.random.split(key)
    x = jax.random.normal(k_x, (batch, input_size), jnp.float32)
    params = init_params(k_p, num_heads, input_size, hidden_sizes, output_size)
    ref = _reference_forward(x, params, num_heads)

    # f32 compute path (tight check against the pure-JAX reference).
    packed_f32 = pack_params(params, compute_dtype=jnp.float32)
    fwd_f32 = jax.jit(functools.partial(parallel_mlp_forward,
                                        num_heads=num_heads,
                                        block_batch=block_batch))
    out = jax.block_until_ready(fwd_f32(x, packed_f32))
    assert out.shape == (batch, output_size, num_heads), out.shape
    assert jnp.allclose(out, ref, atol=1e-4, rtol=1e-4), \
        float(jnp.max(jnp.abs(out - ref)))

    # bf16 compute path (default): bf16 weights + bf16 MXU inputs, f32 accum.
    packed_bf16 = pack_params(params)  # compute_dtype defaults to bf16
    fwd_bf16 = jax.jit(functools.partial(parallel_mlp_forward,
                                         num_heads=num_heads,
                                         block_batch=block_batch))
    out_bf16 = jax.block_until_ready(fwd_bf16(x, packed_bf16))
    assert out_bf16.shape == (batch, output_size, num_heads)
    assert jnp.allclose(out_bf16, ref, atol=5e-2, rtol=5e-2), \
        float(jnp.max(jnp.abs(out_bf16 - ref)))

    print("KERNEL_OK")
</pallas_src>

<mosaic_0001>
module attributes {stable_mosaic.version = 11 : i64} {
  func.func @kernel(%arg0: i32, %arg1: memref<32x20xf32, #tpu.memory_space<vmem>>, %arg2: memref<20x128xf32, #tpu.memory_space<vmem>>, %arg3: memref<1x128xf32, #tpu.memory_space<vmem>>, %arg4: memref<128x128xf32, #tpu.memory_space<vmem>>, %arg5: memref<1x128xf32, #tpu.memory_space<vmem>>, %arg6: memref<128x12xf32, #tpu.memory_space<vmem>>, %arg7: memref<1x12xf32, #tpu.memory_space<vmem>>, %arg8: memref<32x12xf32, #tpu.memory_space<vmem>>) attributes {dimension_semantics = [#tpu.dimension_semantics<parallel>], iteration_bounds = array<i64: 3>, scalar_prefetch = 0 : i64, scratch_operands = 0 : i64, tpu.core_type = #tpu.core_type<tc>, window_params = [{transform_indices = @transform_0, window_bounds = array<i64: 32, 20>}, {pipeline_mode = #tpu.pipeline_mode<synchronous>, transform_indices = @transform_1, window_bounds = array<i64: 20, 128>}, {pipeline_mode = #tpu.pipeline_mode<synchronous>, transform_indices = @transform_2, window_bounds = array<i64: 1, 128>}, {pipeline_mode = #tpu.pipeline_mode<synchronous>, transform_indices = @transform_3, window_bounds = array<i64: 128, 128>}, {pipeline_mode = #tpu.pipeline_mode<synchronous>, transform_indices = @transform_4, window_bounds = array<i64: 1, 128>}, {pipeline_mode = #tpu.pipeline_mode<synchronous>, transform_indices = @transform_5, window_bounds = array<i64: 128, 12>}, {pipeline_mode = #tpu.pipeline_mode<synchronous>, transform_indices = @transform_6, window_bounds = array<i64: 1, 12>}, {transform_indices = @transform_7, window_bounds = array<i64: 32, 12>}]} {
    %c0 = arith.constant 0 : index
    %c0_0 = arith.constant 0 : index
    %0 = vector.load %arg1[%c0, %c0_0] : memref<32x20xf32, #tpu.memory_space<vmem>>, vector<32x20xf32>
    %c0_1 = arith.constant 0 : index
    %c0_2 = arith.constant 0 : index
    %1 = vector.load %arg2[%c0_1, %c0_2] : memref<20x128xf32, #tpu.memory_space<vmem>>, vector<20x128xf32>
    %cst = arith.constant dense<0.000000e+00> : vector<32x128xf32>
    %2 = tpu.matmul %0, %1, %cst {dimension_numbers = #tpu.dot_dimension_numbers<[1], [0], [0], [1], [0, 0, 1, 1], [], []>} : vector<32x20xf32>, vector<20x128xf32>, vector<32x128xf32> -> vector<32x128xf32>
    %c0_3 = arith.constant 0 : index
    %c0_4 = arith.constant 0 : index
    %3 = vector.load %arg3[%c0_3, %c0_4] : memref<1x128xf32, #tpu.memory_space<vmem>>, vector<1x128xf32>
    %4 = vector.broadcast %3 : vector<1x128xf32> to vector<32x128xf32>
    %5 = arith.addf %2, %4 : vector<32x128xf32>
    %cst_5 = arith.constant 0.000000e+00 : f32
    %6 = vector.broadcast %cst_5 : f32 to vector<32x128xf32>
    %7 = arith.maximumf %5, %6 : vector<32x128xf32>
    %c0_6 = arith.constant 0 : index
    %c0_7 = arith.constant 0 : index
    %8 = vector.load %arg4[%c0_6, %c0_7] : memref<128x128xf32, #tpu.memory_space<vmem>>, vector<128x128xf32>
    %cst_8 = arith.constant dense<0.000000e+00> : vector<32x128xf32>
    %9 = tpu.matmul %7, %8, %cst_8 {dimension_numbers = #tpu.dot_dimension_numbers<[1], [0], [0], [1], [0, 0, 1, 1], [], []>} : vector<32x128xf32>, vector<128x128xf32>, vector<32x128xf32> -> vector<32x128xf32>
    %c0_9 = arith.constant 0 : index
    %c0_10 = arith.constant 0 : index
    %10 = vector.load %arg5[%c0_9, %c0_10] : memref<1x128xf32, #tpu.memory_space<vmem>>, vector<1x128xf32>
    %11 = vector.broadcast %10 : vector<1x128xf32> to vector<32x128xf32>
    %12 = arith.addf %9, %11 : vector<32x128xf32>
    %cst_11 = arith.constant 0.000000e+00 : f32
    %13 = vector.broadcast %cst_11 : f32 to vector<32x128xf32>
    %14 = arith.maximumf %12, %13 : vector<32x128xf32>
    %c0_12 = arith.constant 0 : index
    %c0_13 = arith.constant 0 : index
    %15 = vector.load %arg6[%c0_12, %c0_13] : memref<128x12xf32, #tpu.memory_space<vmem>>, vector<128x12xf32>
    %cst_14 = arith.constant dense<0.000000e+00> : vector<32x12xf32>
    %16 = tpu.matmul %14, %15, %cst_14 {dimension_numbers = #tpu.dot_dimension_numbers<[1], [0], [0], [1], [0, 0, 1, 1], [], []>} : vector<32x128xf32>, vector<128x12xf32>, vector<32x12xf32> -> vector<32x12xf32>
    %c0_15 = arith.constant 0 : index
    %c0_16 = arith.constant 0 : index
    %17 = vector.load %arg7[%c0_15, %c0_16] : memref<1x12xf32, #tpu.memory_space<vmem>>, vector<1x12xf32>
    %18 = vector.broadcast %17 : vector<1x12xf32> to vector<32x12xf32>
    %19 = arith.addf %16, %18 : vector<32x12xf32>
    %c0_17 = arith.constant 0 : index
    %c0_18 = arith.constant 0 : index
    %20 = vector.load %arg8[%c0_17, %c0_18] : memref<32x12xf32, #tpu.memory_space<vmem>>, vector<32x12xf32>
    tpu.vector_store %arg8[%c0_17, %c0_18], %19 {strides = array<i32>} : memref<32x12xf32, #tpu.memory_space<vmem>>, vector<32x12xf32>,
    return
  }
  func.func @transform_0(%arg0: i32) -> (i32, i32) {
    %c0_i32 = arith.constant 0 : i32
    %c0_i32_0 = arith.constant 0 : i32
    return %arg0, %c0_i32 : i32, i32
  }
  func.func @transform_1(%arg0: i32) -> (i32, i32) {
    %c0_i32 = arith.constant 0 : i32
    %c0_i32_0 = arith.constant 0 : i32
    %c0_i32_1 = arith.constant 0 : i32
    return %c0_i32, %c0_i32_0 : i32, i32
  }
  func.func @transform_2(%arg0: i32) -> (i32, i32) {
    %c0_i32 = arith.constant 0 : i32
    %c0_i32_0 = arith.constant 0 : i32
    %c0_i32_1 = arith.constant 0 : i32
    return %c0_i32, %c0_i32_0 : i32, i32
  }
  func.func @transform_3(%arg0: i32) -> (i32, i32) {
    %c0_i32 = arith.constant 0 : i32
    %c0_i32_0 = arith.constant 0 : i32
    %c0_i32_1 = arith.constant 0 : i32
    return %c0_i32, %c0_i32_0 : i32, i32
  }
  func.func @transform_4(%arg0: i32) -> (i32, i32) {
    %c0_i32 = arith.constant 0 : i32
    %c0_i32_0 = arith.constant 0 : i32
    %c0_i32_1 = arith.constant 0 : i32
    return %c0_i32, %c0_i32_0 : i32, i32
  }
  func.func @transform_5(%arg0: i32) -> (i32, i32) {
    %c0_i32 = arith.constant 0 : i32
    %c0_i32_0 = arith.constant 0 : i32
    %c0_i32_1 = arith.constant 0 : i32
    return %c0_i32, %c0_i32_0 : i32, i32
  }
  func.func @transform_6(%arg0: i32) -> (i32, i32) {
    %c0_i32 = arith.constant 0 : i32
    %c0_i32_0 = arith.constant 0 : i32
    %c0_i32_1 = arith.constant 0 : i32
    return %c0_i32, %c0_i32_0 : i32, i32
  }
  func.func @transform_7(%arg0: i32) -> (i32, i32) {
    %c0_i32 = arith.constant 0 : i32
    %c0_i32_0 = arith.constant 0 : i32
    return %arg0, %c0_i32 : i32, i32
  }
}

</mosaic_0001>

<bundles_post_ra>
// kernel: parallel_mlp_forward.1
= control target key start
LH: loop header
LB: loop body
LE: loop exit
PB: predicated region body
PF: predicated region fallthrough
CT: control target
= control target key end

     0   :  { %s1326_s24 = smov 0   ;;  %s1328_s25 = smov 0   ;;  %s1546_s0 = inlined_call_operand.vmem [shape: f32[80,20], index: 0, kind: input, shape index: {}]   ;;  %s1547_s1 = inlined_call_operand.vmem [shape: f32[20,128], index: 1, kind: input, shape index: {}]   ;;  %s1548_s2 = inlined_call_operand.vmem [shape: f32[1,128], index: 2, kind: input, shape index: {}]   ;;  %s1549_s3 = inlined_call_operand.vmem [shape: f32[128,128], index: 3, kind: input, shape index: {}]   ;;  %s1550_s4 = inlined_call_operand.vmem [shape: f32[1,128], index: 4, kind: input, shape index: {}]   ;;  %s1551_s5 = inlined_call_operand.vmem [shape: f32[128,12], index: 5, kind: input, shape index: {}]   ;;  %s1552_s6 = inlined_call_operand.vmem [shape: f32[1,12], index: 6, kind: input, shape index: {}]   ;;  %s1553_s7 = inlined_call_operand.vmem [shape: f32[80,12], index: 7, kind: output, shape index: {}]  }
   0x1   :  { %s1330_s26 = smov 0  }
   0x2 LB: > { %s1339_s27 = sadd.s32 4294967295, %s1252_s26   ;;  %s1341_s28 = sadd.s32 1, %s1252_s26   ;;  %s1252_s26 = sphi %s1330_s26, %s1560_s26   ;;  %s1248_s25 = sphi %s1328_s25, %s1559_s25   ;;  %s1244_s24 = sphi %s1326_s24, %s1558_s24  }
   0x3   : > { %s173_s29 = ssub.s32 %s1252_s26, %s1341_s28  ;;  %s176_s30 = sadd.s32 1, %s1248_s25 }
   0x4   : > { %p174_p0 = scmp.eq.s32.totalorder %s173_s29, 0  ;;  %p186_p1 = scmp.ne.s32.totalorder %s1248_s25, %s1244_s24 }
   0x5   : > { %p187_p2 = scmp.eq.s32.totalorder %s1339_s27, 2  ;;  %p875_p3 = scmp.ge.s32.totalorder %s1252_s26, 1 }
   0x6   : > { %s1349_s8 = scalar_select %p174_p0, %s1248_s25, %s176_s30  }
   0x7   : > { %p1351_p4 = por %p187_p2, %p186_p1  ;;  %p246_p5 = scmp.lt.s32.totalorder %s1252_s26, 4 }
   0x9   : > { %p247_p6 = pnand %p875_p3, %p246_p5 }
   0xa   : > { %v304_v0 = vld [vmem:[%s1547_s1] sm:$0xff] (!%p247_p6)  ;;  %v305_v1 = vld [vmem:[%s1547_s1 + $0x8] sm:$0xff] (!%p247_p6)  ;;  %s1362_s14 = sshll.u32 (!%p247_p6), %s1339_s27, 2  ;;  %v422_v5 = vld [vmem:[%s1549_s3 + $0x10] sm:$0xff] (!%p247_p6)  ;;  %vm327_vm0 = vcmask (!%p247_p6), 1043456   ;;  %vm314_vm1 = vcmask (!%p247_p6), 162816  }
   0xb   : > { %250 = sbr.rel (%p247_p6) target bundleno = 729 (0x2d9), region = 48  ;;  %v1042_v2 = vpack.c.bf16 (!%p247_p6), %v305_v1, %v304_v0  ;;  %p286_p7 = scmp.lt.s32.totalorder (!%p247_p6), %s1362_s14, 9  ;;  %v420_v3 = vld [vmem:[%s1549_s3] sm:$0xff] (!%p247_p6)  ;;  %v421_v4 = vld [vmem:[%s1549_s3 + $0x8] sm:$0xff] (!%p247_p6)  ;;  %v306_v6 = vld [vmem:[%s1547_s1 + $0x10] sm:$0xf] (!%p247_p6) }
   0xc   : > { %v1046_v7 = vpack.c.bf16 (!%p247_p6), %v421_v4, %v420_v3  ;;  %v423_v8 = vld [vmem:[%s1549_s3 + $0x18] sm:$0xff] (!%p247_p6)  ;;  %v424_v10 = vld [vmem:[%s1549_s3 + $0x20] sm:$0xff] (!%p247_p6)  ;;  %v425_v11 = vld [vmem:[%s1549_s3 + $0x28] sm:$0xff] (!%p247_p6)  ;;  %s278_s30 = sand.u32 (!%p247_p6), 1, %s1244_s24   ;;  %vm640_vm2 = vcmask (!%p247_p6), 97280  }
   0xd   : > { %1043 = vmatprep.subr.bf16.mxu0 (!%p247_p6), %v1042_v2  ;;  %v1050_v9 = vpack.c.bf16 (!%p247_p6), %v423_v8, %v422_v5  ;;  %v1054_v12 = vpack.c.bf16 (!%p247_p6), %v425_v11, %v424_v10  ;;  %v426_v13 = vld [vmem:[%s1549_s3 + $0x30] sm:$0xff] (!%p247_p6)  ;;  %v427_v14 = vld [vmem:[%s1549_s3 + $0x38] sm:$0xff] (!%p247_p6)  ;;  %v428_v20 = vld [vmem:[%s1549_s3 + $0x40] sm:$0xff] (!%p247_p6)  ;;  %s876_s10 = sshll.u32 (!%p247_p6), %s278_s30, 5 }
   0xe   : > { %1045 = vmatpush3.bf16.msra.mxu0 (!%p247_p6), %v1042_v2  ;;  %1047 = vmatprep.subr.bf16.mxu1 (!%p247_p6), %v1046_v7  ;;  %v1058_v19 = vpack.c.bf16 (!%p247_p6), %v427_v14, %v426_v13  ;;  %v429_v21 = vld [vmem:[%s1549_s3 + $0x48] sm:$0xff] (!%p247_p6)  ;;  %v430_v23 = vld [vmem:[%s1549_s3 + $0x50] sm:$0xff] (!%p247_p6)  ;;  %v431_v24 = vld [vmem:[%s1549_s3 + $0x58] sm:$0xff] (!%p247_p6) }
   0xf   : > { %958 = vmatprep.subr.msk.mxu0 (!%p247_p6), %vm327_vm0, %v306_v6  ;;  %1049 = vmatpush3.bf16.msra.mxu1 (!%p247_p6), %v1046_v7  ;;  %v1062_v22 = vpack.c.bf16 (!%p247_p6), %v429_v21, %v428_v20  ;;  %v1066_v25 = vpack.c.bf16 (!%p247_p6), %v431_v24, %v430_v23  ;;  %v432_v26 = vld [vmem:[%s1549_s3 + $0x60] sm:$0xff] (!%p247_p6)  ;;  %v433_v27 = vld [vmem:[%s1549_s3 + $0x68] sm:$0xff] (!%p247_p6)  ;;  %v434_v29 = vld [vmem:[%s1549_s3 + $0x70] sm:$0xff] (!%p247_p6) }
  0x10   : > { %1051 = vmatprep.subr.bf16.mxu1 (!%p247_p6), %v1050_v9  ;;  %v1070_v28 = vpack.c.bf16 (!%p247_p6), %v433_v27, %v432_v26  ;;  %v435_v30 = vld [vmem:[%s1549_s3 + $0x78] sm:$0xff] (!%p247_p6)  ;;  %v532_v32 = vld [vmem:[%s1551_s5] sm:$0xff] (!%p247_p6)  ;;  %v533_v33 = vld [vmem:[%s1551_s5 + $0x8] sm:$0xff] (!%p247_p6) }
  0x11   : > { %v1074_v31 = vpack.c.bf16 (!%p247_p6), %v435_v30, %v434_v29  ;;  %v534_v34 = vld [vmem:[%s1551_s5 + $0x10] sm:$0xff] (!%p247_p6)  ;;  %v1078_v35 = vpack.c.bf16 (!%p247_p6), %v533_v33, %v532_v32  ;;  %v535_v36 = vld [vmem:[%s1551_s5 + $0x18] sm:$0xff] (!%p247_p6)  ;;  %v536_v38 = vld [vmem:[%s1551_s5 + $0x20] sm:$0xff] (!%p247_p6) }
  0x12   : > { %s287_s29 = scalar_select %p286_p7, %s1362_s14, 9  ;;  %959 = vmatpush3.msk.msra.mxu0 %vm327_vm0, %v306_v6  ;;  %v1082_v37 = vpack.c.bf16 %v535_v36, %v534_v34  ;;  %v537_v39 = vld [vmem:[%s1551_s5 + $0x28] sm:$0xff]  ;;  %v538_v41 = vld [vmem:[%s1551_s5 + $0x30] sm:$0xff]  ;;  %v539_v42 = vld [vmem:[%s1551_s5 + $0x38] sm:$0xff] }
  0x13   : > { %1053 = vmatpush3.bf16.msra.mxu1 %v1050_v9  ;;  %1079 = vmatprep.subr.bf16.mxu0 %v1078_v35  ;;  %v1086_v40 = vpack.c.bf16 %v537_v39, %v536_v38  ;;  %v1090_v43 = vpack.c.bf16 %v539_v42, %v538_v41  ;;  %v540_v44 = vld [vmem:[%s1551_s5 + $0x40] sm:$0xff]  ;;  %v541_v45 = vld [vmem:[%s1551_s5 + $0x48] sm:$0xff]  ;;  %v542_v47 = vld [vmem:[%s1551_s5 + $0x50] sm:$0xff]  ;;  %s653_s24 = ssub.s32 (%p1351_p4), 10, %s1362_s14  ;;  %s904_s15 = sshll.u32 (%p1351_p4), %s1339_s27, 5 }
  0x14   : > { %s878_s13 = sshll.u32 %s287_s29, 3  ;;  %1055 = vmatprep.subr.bf16.mxu1 %v1054_v12  ;;  %v1094_v46 = vpack.c.bf16 %v541_v45, %v540_v44  ;;  %v543_v48 = vld [vmem:[%s1551_s5 + $0x58] sm:$0xff]  ;;  %v544_v50 = vld [vmem:[%s1551_s5 + $0x60] sm:$0xff]  ;;  %v545_v51 = vld [vmem:[%s1551_s5 + $0x68] sm:$0xff]  ;;  %p654_p8 = scmp.lt.s32.totalorder (%p1351_p4), %s653_s24, 4 }
  0x15   : > { %s289_s17 = scalar_lea.vmem %s1546_s0, %s878_s13  ;;  %v1098_v49 = vpack.c.bf16 %v543_v48, %v542_v47  ;;  %v1102_v52 = vpack.c.bf16 %v545_v51, %v544_v50  ;;  %v879_v53 = vld [vmem:[%s1548_s2] ss:$0 sm:$0xff]  ;;  %v546_v2 = vld [vmem:[%s1551_s5 + $0x70] sm:$0xff]  ;;  %v547_v3 = vld [vmem:[%s1551_s5 + $0x78] sm:$0xff]  ;;  %s1484_s13 = scalar_lea.vmem [#allocation2], %s876_s10  }
  0x16   : > { %v300_v15 = vld [vmem:[%s289_s17] sm:$0xff]  ;;  %v301_v16 = vld [vmem:[%s289_s17 + $0x8] sm:$0xff]  ;;  %v302_v17 = vld [vmem:[%s289_s17 + $0x10] sm:$0xff]  ;;  %v1106_v4 = vpack.c.bf16 %v547_v3, %v546_v2  ;;  %s1497_s18 = scalar_lea.vmem (%p1351_p4), %s1553_s7, %s904_s15  }
  0x17   : > { %960 = vmatprep.mubr.msk.f32.mxu0 %vm314_vm1, %v300_v15  ;;  %v303_v18 = vld [vmem:[%s289_s17 + $0x18] sm:$0xff]  ;;  %1057 = vmatpush3.bf16.msra.mxu1 %v1054_v12  ;;  %v885_v5 = vld [vmem:[%s1550_s4] ss:$0 sm:$0xff] }
  0x18   : > { %961 = vmatmul.mubr.msk.f32.vlgmr.msra.gmra.mrb[0].mxu0 %vm314_vm1, %v301_v16  ;;  %1059 = vmatprep.subr.bf16.mxu1 %v1058_v19 }
  0x19   : > { %963 = vmatprep.mubr.msk.f32.mxu0 %vm314_vm1, %v302_v17  ;;  %1081 = vmatpush3.bf16.msra.mxu0 %v1078_v35 }
  0x1a   : > { %1083 = vmatprep.subr.bf16.mxu0 %v1082_v37 }
  0x1b   : > { %1061 = vmatpush3.bf16.msra.mxu1 %v1058_v19 }
  0x1c   : > { %964 = vmatmul.mubr.msk.f32.gmra.mrb[2].mxu0 %vm314_vm1, %v303_v18  ;;  %1063 = vmatprep.subr.bf16.mxu1 %v1062_v22  ;;  %v886_v18 = vld [vmem:[%s1552_s6] ss:$0 sm:$0xff] }
  0x1d   : > { %1085 = vmatpush3.bf16.msra.mxu0 %v1082_v37 }
  0x1e   : > { %1087 = vmatprep.subr.bf16.mxu0 %v1086_v40 }
  0x1f   : > { %1065 = vmatpush3.bf16.msra.mxu1 %v1062_v22 }
  0x20   : > { %1067 = vmatprep.subr.bf16.mxu1 %v1066_v25 }
  0x21   : > { %1089 = vmatpush3.bf16.msra.mxu0 %v1086_v40 }
  0x22   : > { %1091 = vmatprep.subr.bf16.mxu0 %v1090_v43 }
  0x23   : > { %1069 = vmatpush3.bf16.msra.mxu1 %v1066_v25 }
  0x24   : > { %1071 = vmatprep.subr.bf16.mxu1 %v1070_v28 }
  0x25   : > { %1093 = vmatpush3.bf16.msra.mxu0 %v1090_v43 }
  0x26   : > { %1095 = vmatprep.subr.bf16.mxu0 %v1094_v46 }
  0x27   : > { %1073 = vmatpush3.bf16.msra.mxu1 %v1070_v28 }
  0x28   : > { %1075 = vmatprep.subr.bf16.mxu1 %v1074_v31 }
  0x29   : > { %1097 = vmatpush3.bf16.msra.mxu0 %v1094_v46 }
  0x2a   : > { %1099 = vmatprep.subr.bf16.mxu0 %v1098_v49 }
  0x2b   : > { %1077 = vmatpush3.bf16.msra.mxu1 %v1074_v31 }
  0x2d   : > { %1101 = vmatpush3.bf16.msra.mxu0 %v1098_v49 }
  0x2e   : > { %1103 = vmatprep.subr.bf16.mxu0 %v1102_v52 }
  0x31   : > { %1105 = vmatpush3.bf16.msra.mxu0 %v1102_v52 }
  0x32   : > { %1107 = vmatprep.subr.bf16.mxu0 %v1106_v4 }
  0x35   : > { %1109 = vmatpush3.bf16.msra.mxu0 %v1106_v4 }
  0xeb   : > { %v962_v54 = vpop.f32.mrb[0].mxu0 }
  0xec   : > { %v403_v55 = vadd.f32 %v962_v54, %v879_v53  ;;  %v397_v56 = vpop.f32.mrb[1].mxu0 }
  0xed   : > { %v398_v57 = vadd.f32 %v879_v53, %v397_v56 }
  0xee   : > { %v417_v60 = vmax.f32 %v403_v55, 0.0 }
  0xef   : > { %v965_v58 = vpop.f32.mrb[2].mxu0  ;;  %v416_v59 = vmax.f32 %v398_v57, 0.0 }
  0xf0   : > { %v413_v61 = vadd.f32 %v965_v58, %v879_v53  ;;  %v407_v62 = vpop.f32.mrb[3].mxu0 }
  0xf1   : > { %v408_v63 = vadd.f32 %v879_v53, %v407_v62  ;;  %998 = vmatprep.mubr.f32.mxu1 %v416_v59 }
  0xf2   : > { %999 = vmatmul.mubr.f32.vlgmr.msra.gmra.mrb[0].mxu1 %v417_v60  ;;  %v419_v1 = vmax.f32 %v413_v61, 0.0 }
  0xf3   : > { %v418_v0 = vmax.f32 %v408_v63, 0.0 }
  0xf5   : > { %1001 = vmatprep.mubr.f32.mxu1 %v418_v0 }
  0xf6   : > { %1002 = vmatmul.mubr.f32.gmra.mrb[2].mxu1 %v419_v1 }
 0x1c5   : > { %v1000_v6 = vpop.f32.mrb[0].mxu1 }
 0x1c6   : > { %v515_v7 = vadd.f32 %v1000_v6, %v885_v5  ;;  %v509_v8 = vpop.f32.mrb[1].mxu1 }
 0x1c7   : > { %v510_v9 = vadd.f32 %v885_v5, %v509_v8 }
 0x1c8   : > { %v529_v12 = vmax.f32 %v515_v7, 0.0 }
 0x1c9   : > { %v528_v10 = vmax.f32 %v510_v9, 0.0  ;;  %v1003_v11 = vpop.f32.mrb[2].mxu1 }
 0x1ca   : > { %v525_v13 = vadd.f32 %v1003_v11, %v885_v5  ;;  %v519_v14 = vpop.f32.mrb[3].mxu1 }
 0x1cb   : > { %v520_v15 = vadd.f32 %v885_v5, %v519_v14  ;;  %1036 = vmatprep.mubr.f32.mxu0 %v528_v10 }
 0x1cc   : > { %1037 = vmatmul.mubr.f32.vlgmr.msra.gmra.mrb[4].mxu0 %v529_v12  ;;  %v531_v17 = vmax.f32 %v525_v13, 0.0 }
 0x1cd   : > { %v530_v16 = vmax.f32 %v520_v15, 0.0 }
 0x1cf   : > { %1039 = vmatprep.mubr.f32.mxu0 %v530_v16 }
 0x1d0   : > { %1040 = vmatmul.mubr.f32.gmra.mrb[6].mxu0 %v531_v17 }
 0x29f   : > { %v1038_v19 = vpop.f32.mrb[4].mxu0 }
 0x2a0   : > { %v627_v20 = vadd.f32 %v1038_v19, %v886_v18  ;;  %v621_v21 = vpop.f32.mrb[5].mxu0 }
 0x2a1   : > { %v622_v22 = vadd.f32 %v886_v18, %v621_v21  ;;  %651 = sbr.rel (!%p1351_p4) target bundleno = 729 (0x2d9), region = 52 }
 0x2a2   : > { %642 = vst.msk [vmem:[%s1484_s13 + $0x8] sm:$0xff] %vm640_vm2, %v627_v20 }
 0x2a3   : > { %641 = vst.msk [vmem:[%s1484_s13] sm:$0xff] %vm640_vm2, %v622_v22  ;;  %v1041_v23 = vpop.f32.mrb[6].mxu0 }
 0x2a4   : > { %v637_v24 = vadd.f32 %v1041_v23, %v886_v18  ;;  %v631_v25 = vpop.f32.mrb[7].mxu0 }
 0x2a5   : > { %v632_v26 = vadd.f32 %v886_v18, %v631_v25 }
 0x2a6   : > { %644 = vst.msk [vmem:[%s1484_s13 + $0x18] sm:$0xff] %vm640_vm2, %v637_v24 }
 0x2a7   : > { %643 = vst.msk [vmem:[%s1484_s13 + $0x10] sm:$0xff] %vm640_vm2, %v632_v26 }
 0x2a8   : > { %s1562_s24 = smov (!%p654_p8, %s653_s24), 4 }
 0x2a9   : > { %s889_s19 = sshll.u32 %s1562_s24, 7 }
 0x2aa   : > { %p892_p9 = scmp.eq.s32.totalorder %s889_s19, 0 }
 0x2ab   : > { %s1503_s20 = sshrl.u32 (!%p892_p9), %s1562_s24, 2 }
 0x2ac   : > { %662 = sbr.rel (%p892_p9) target bundleno = 729 (0x2d9), region = 56  ;;  %p893_p10 = scmp.le.s32.totalorder (!%p892_p9), %s1503_s20, 0 }
 0x2b3   : > { %828 = sbr.rel (%p893_p10) target bundleno = 708 (0x2c4), region = 132  ;;  %s1555_s27 = smov (!%p893_p10), %s1497_s18 }
 0x2b4   : > { %s1556_s9 = smov (!%p893_p10), %s1484_s13  ;;  %s1512_s14 = smov (!%p893_p10), 0  }
 0x2b5   : > { %s1266_s21 = smov (!%p893_p10), 0  }
 0x2ba LB: >> { %v730_v27 = vld [vmem:[%s1260_s9] sm:$0xff]  ;;  %v732_v28 = vld [vmem:[%s1260_s9 + $0x8] sm:$0xff]  ;;  %v734_v29 = vld [vmem:[%s1260_s9 + $0x10] sm:$0xff]  ;;  %s738_s22 = sadd.s32 1, %s1264_s14  ;;  %s724_s21 = sadd.s32 1, %s1268_s21   ;;  %s1268_s21 = sphi %s1266_s21, %s724_s21   ;;  %s1264_s14 = sphi %s1512_s14, %s1557_s14   ;;  %s1260_s9 = sphi %s1556_s9, %s743_s9   ;;  %s1256_s27 = sphi %s1555_s27, %s744_s27  }
 0x2bb   : >> { %731 = vst [vmem:[%s1256_s27] sm:$0xff] %v730_v27  ;;  %733 = vst [vmem:[%s1256_s27 + $0x8] sm:$0xff] %v732_v28  ;;  %v736_v30 = vld [vmem:[%s1260_s9 + $0x18] sm:$0xff]  ;;  %p739_p11 = scmp.ge.s32.totalorder %s738_s22, %s1503_s20  ;;  %p723_p12 = scmp.ge.s32.totalorder %s724_s21, %s1503_s20 }
 0x2bc   : >> { %735 = vst [vmem:[%s1256_s27 + $0x10] sm:$0xff] %v734_v29  ;;  %737 = vst [vmem:[%s1256_s27 + $0x18] sm:$0xff] %v736_v30 }
 0x2bd   : >> { %s1564_s22 = smov (%p739_p11, %s738_s22), 0  ;;  %726 = sbr.rel (!%p723_p12) target bundleno = 698 (0x2ba), region = 138 }
 0x2be   : >> { %s894_s23 = sshll.u32 %s1564_s22, 5  ;;  %s1557_s14 = smov %s1564_s22 }
 0x2bf   : >> { %s743_s9 = scalar_lea.vmem %s1484_s13, %s894_s23 [#allocation2]   ;;  %s744_s27 = scalar_lea.vmem %s1497_s18, %s894_s23  }
 0x2c4 PF: > { %s1528_s26 = sand.u32 3, %s1562_s24   ;;  %s905_s29 = sshll.u32 %s1503_s20, 5 }
 0x2c5   : > { %s749_s30 = scalar_lea.vmem %s1484_s13, %s905_s29 [#allocation2]   ;;  %s751_s10 = scalar_lea.vmem %s1497_s18, %s905_s29  }
 0x2c6   : > { %p899_p13 = scmp.le.s32.totalorder %s1528_s26, 0 }
 0x2c7   : > { %s1270_s11 = smov (!%p899_p13), %s751_s10   ;;  %s1274_s12 = smov (!%p899_p13), %s749_s30  }
 0x2c8   : > { %842 = sbr.rel (%p899_p13) target bundleno = 729 (0x2d9), region = 143  ;;  %s1278_s15 = smov (!%p899_p13), 0  }
 0x2c9   : > { %s1282_s16 = smov (!%p899_p13), 0  }
 0x2cf LB: >> { %v761_v31 = vld [vmem:[%s1276_s12] sm:$0xff]  ;;  %s763_s24 = sadd.s32 1, %s1280_s15  ;;  %s755_s16 = sadd.s32 1, %s1284_s16   ;;  %s1284_s16 = sphi %s1282_s16, %s755_s16   ;;  %s1280_s15 = sphi %s1278_s15, %s1279_s15   ;;  %s1276_s12 = sphi %s1274_s12, %s768_s12   ;;  %s1272_s11 = sphi %s1270_s11, %s769_s11  }
 0x2d0   : >> { %762 = vst [vmem:[%s1272_s11] sm:$0xff] %v761_v31  ;;  %p764_p0 = scmp.ge.s32.totalorder %s763_s24, %s1528_s26  ;;  %p754_p1 = scmp.ge.s32.totalorder %s755_s16, %s1528_s26 }
 0x2d2   : >> { %s1566_s24 = smov (%p764_p0, %s763_s24), 0  ;;  %757 = sbr.rel (!%p754_p1) target bundleno = 719 (0x2cf), region = 149 }
 0x2d3   : >> { %s900_s13 = sshll.u32 %s1566_s24, 3  ;;  %s1279_s15 = smov %s1566_s24  }
 0x2d4   : >> { %s768_s12 = scalar_lea.vmem %s749_s30, %s900_s13 [#allocation2]   ;;  %s769_s11 = scalar_lea.vmem %s751_s10, %s900_s13  }
 0x2d9 PF: > { %p14_p2 = scmp.ge.s32.totalorder %s1341_s28, 5   ;;  %s1558_s24 = smov %s1248_s25 }
 0x2da   : > { %s1559_s25 = smov %s1349_s8  ;;  %s1560_s26 = smov %s1341_s28 }
 0x2db   :  { %16 = sbr.rel (!%p14_p2) target bundleno = 2 (0x2), region = 160 }

</bundles_post_ra>
